<compile_context>
chip_gen: v7x
topology: tpu7x:2x2x1
jax: 0.10.0
libtpu: 0.0.40
codegen_flags: <defaults>
</compile_context>

<pallas_src>
import functools

import jax
import jax.numpy as jnp
import numpy as np
from jax.experimental import pallas as pl
from jax.experimental.pallas import tpu as pltpu

EPS = 1e-5          # PyTorch InstanceNorm2d default (affine=False, biased variance)
IN_BYTES = 2        # bf16 operands
OUT_BYTES = 4       # f32 output slab / accumulators


def _round_up(x, m):
    return (x + m - 1) // m * m


def _vmem_limit_bytes():
    cap = 64 * 1024 * 1024                      # conservative fallback (v7x-sized)
    try:
        cap = int(pltpu.get_tpu_info().vmem_capacity_bytes)
    except Exception:
        pass
    # ~75% of physical VMEM: ~96 MiB on v5e/v6e (128 MiB), ~48 MiB on v7x (64 MiB)
    return max(32 * 1024 * 1024, min(3 * cap // 4, 100 * 1024 * 1024))


def _choose_tile_rows(HW, fits, max_rows):
    cap = min(max_rows, _round_up(HW, 8))
    cap = max(8, cap - cap % 8)
    best = 0
    for t in range(8, cap + 1, 8):              # prefer a divisor of HW: mask-free
        if HW % t == 0 and fits(t):
            best = t
    if best:
        return best
    t = cap                                     # no divisor -> largest that fits
    while t > 8 and not fits(t):
        t -= 8
    return t


def _plan(HW, Kb, Cp, vmem_limit, max_tile_rows, force_two_pass):
    """Decide one-pass vs two-pass and the row-tile size from the VMEM budget."""
    budget = int(vmem_limit * 0.85)             # slack for Mosaic-internal scratch
    w_buf = 2 * Kb * Cp * IN_BYTES              # weight (double-buffered by default)
    misc = 8 * Cp * OUT_BYTES + (1 << 20)       # stats scratch + semaphores + slack

    def one_pass_ok(tr):
        hwp = _round_up(HW, tr)
        return (w_buf + 2 * tr * Kb * IN_BYTES          # patch tiles (x2 buffers)
                + 2 * hwp * Cp * OUT_BYTES + misc       # resident image (x2 buffers)
                ) <= budget

    def two_pass_ok(tr):
        pass_a = w_buf + 2 * tr * Kb * IN_BYTES + 2 * tr * Cp * OUT_BYTES + misc
        pass_b = 4 * tr * Cp * OUT_BYTES + misc
        return max(pass_a, pass_b) <= budget

    one_pass = (not force_two_pass) and one_pass_ok(8)
    tile_rows = _choose_tile_rows(HW, one_pass_ok if one_pass else two_pass_ok,
                                  max_tile_rows)
    return one_pass, tile_rows


def _accumulate_stats(acc, sum_ref, sq_ref, r, nr, hw_valid, tile_rows, needs_mask):
    """Per-channel sum / sum-of-squares; mask only the last (padded) row tile."""
    if needs_mask:                               # static python bool
        @pl.when(r == nr - 1)
        def _last():
            row = jax.lax.broadcasted_iota(jnp.int32, acc.shape, 0) + r * tile_rows
            a = jnp.where(row < hw_valid, acc, 0.0)
            sum_ref[...] += jnp.sum(a, axis=0, keepdims=True)
            sq_ref[...] += jnp.sum(a * a, axis=0, keepdims=True)

        @pl.when(r != nr - 1)
        def _rest():
            sum_ref[...] += jnp.sum(acc, axis=0, keepdims=True)
            sq_ref[...] += jnp.sum(acc * acc, axis=0, keepdims=True)
    else:
        sum_ref[...] += jnp.sum(acc, axis=0, keepdims=True)
        sq_ref[...] += jnp.sum(acc * acc, axis=0, keepdims=True)


# ---------------------------------------------------------------------------
# One-pass kernel: per-image output resident in VMEM, normalize in finalize.
# ---------------------------------------------------------------------------
def _conv_norm_kernel(p_ref, w_ref, o_ref, sum_ref, sq_ref,
                      *, hw_valid, tile_rows, inv_hw, needs_mask):
    # p_ref : (1, tile_rows, Kb) bf16   im2col rows (+1 bias column of ones)
    # w_ref : (Kb, Cp)           bf16   weight with bias folded into row K
    # o_ref : (1, HWp, Cp)       f32    whole-image output, resident across r
    r = pl.program_id(1)
    nr = pl.num_programs(1)

    @pl.when(r == 0)
    def _init():
        sum_ref[...] = jnp.zeros_like(sum_ref)
        sq_ref[...] = jnp.zeros_like(sq_ref)

    # conv (+ bias via the ones column) as one MXU matmul, f32 accumulation, ReLU
    acc = jnp.dot(p_ref[0], w_ref[...], preferred_element_type=jnp.float32)
    acc = jnp.maximum(acc, 0.0)

    row0 = pl.multiple_of(r * tile_rows, tile_rows)
    o_ref[0, pl.ds(row0, tile_rows), :] = acc.astype(o_ref.dtype)

    _accumulate_stats(acc, sum_ref, sq_ref, r, nr, hw_valid, tile_rows, needs_mask)

    @pl.when(r == nr - 1)
    def _finalize():
        mean = sum_ref[...] * inv_hw
        # E[x^2] - E[x]^2 in f32 (post-ReLU activations -> cancellation is benign)
        var = jnp.maximum(sq_ref[...] * inv_hw - mean * mean, 0.0)
        scale = jax.lax.rsqrt(var + EPS)

        def norm_chunk(i, carry):                # chunked in-place normalize
            s = pl.multiple_of(i * tile_rows, tile_rows)
            blk = o_ref[0, pl.ds(s, tile_rows), :]
            o_ref[0, pl.ds(s, tile_rows), :] = ((blk - mean) * scale).astype(o_ref.dtype)
            return carry

        jax.lax.fori_loop(0, nr, norm_chunk, 0)


# ---------------------------------------------------------------------------
# Two-pass streaming fallback (used when the resident image won't fit in VMEM,
# e.g. large images on v7x): pass A = conv+ReLU+stats, pass B = normalize.
# ---------------------------------------------------------------------------
def _conv_stats_kernel(p_ref, w_ref, y_ref, mean_ref, scale_ref, sum_ref, sq_ref,
                       *, hw_valid, tile_rows, inv_hw, needs_mask):
    r = pl.program_id(1)
    nr = pl.num_programs(1)

    @pl.when(r == 0)
    def _init():
        sum_ref[...] = jnp.zeros_like(sum_ref)
        sq_ref[...] = jnp.zeros_like(sq_ref)

    acc = jnp.dot(p_ref[0], w_ref[...], preferred_element_type=jnp.float32)
    acc = jnp.maximum(acc, 0.0)
    y_ref[0] = acc.astype(y_ref.dtype)

    _accumulate_stats(acc, sum_ref, sq_ref, r, nr, hw_valid, tile_rows, needs_mask)

    @pl.when(r == nr - 1)
    def _finalize():
        mean = sum_ref[...] * inv_hw
        var = jnp.maximum(sq_ref[...] * inv_hw - mean * mean, 0.0)
        mean_ref[0] = mean
        scale_ref[0] = jax.lax.rsqrt(var + EPS)


def _normalize_kernel(y_ref, mean_ref, scale_ref, o_ref):
    o_ref[0] = ((y_ref[0] - mean_ref[0]) * scale_ref[0]).astype(o_ref.dtype)


# ---------------------------------------------------------------------------
# Wrapper
# ---------------------------------------------------------------------------
@functools.partial(jax.jit, static_argnames=("padding", "max_tile_rows",
                                              "force_two_pass"))
def conv_norm_forward(x_nchw, w_oihw, bias, padding=1, max_tile_rows=512,
                      force_two_pass=False):
    """x_nchw: (N, Cin, H, W); w_oihw: (Cout, Cin, KH, KW); bias: (Cout,)."""
    N, Cin, H, W = x_nchw.shape
    Cout, _, KH, KW = w_oihw.shape
    HW = H * W
    K = Cin * KH * KW
    Kb = K + 1                       # +1 all-ones column folds the bias into the dot
    Cp = _round_up(Cout, 128)        # lane-dense output channels

    vmem_limit = _vmem_limit_bytes()
    one_pass, tile_rows = _plan(HW, Kb, Cp, vmem_limit, max_tile_rows, force_two_pass)
    R = pl.cdiv(HW, tile_rows)
    HWp = R * tile_rows
    needs_mask = HWp != HW

    # ---- wrapper-side glue: im2col in bf16, fold bias, pad rows/channels ----
    patches = jax.lax.conv_general_dilated_patches(
        x_nchw.astype(jnp.bfloat16), filter_shape=(KH, KW), window_strides=(1, 1),
        padding=[(padding, padding), (padding, padding)])
    # (N, Cin*KH*KW, H, W) with the channel dim flattened as (Cin, KH, KW)
    patches = jnp.transpose(patches, (0, 2, 3, 1)).reshape(N, HW, K)
    # Append the bias column (==1) and pad rows to HWp.  Rows >= HW are junk by
    # construction: they are excluded from the statistics and sliced off below.
    patches = jnp.pad(patches, ((0, 0), (0, HWp - HW), (0, 1)), constant_values=1.0)

    # weight reordered to the patch K layout (Cin, KH, KW); bias stored as row K
    w = jnp.transpose(w_oihw, (1, 2, 3, 0)).reshape(K, Cout)
    w = jnp.concatenate([w, bias.reshape(1, Cout)], axis=0)
    w = jnp.pad(w, ((0, 0), (0, Cp - Cout))).astype(jnp.bfloat16)

    cparams = pltpu.CompilerParams(
        dimension_semantics=("parallel", "arbitrary"),
        vmem_limit_bytes=vmem_limit)
    # NOTE: on v7x with N == 1 the second TensorCore is idle; splitting the row
    # range per core with a cross-core stats combine is a further ~2x (not done).

    patch_spec = pl.BlockSpec((1, tile_rows, Kb), lambda n, r: (n, r, 0))
    w_spec = pl.BlockSpec((Kb, Cp), lambda n, r: (0, 0))    # constant -> fetched once

    if one_pass:
        kernel = functools.partial(
            _conv_norm_kernel, hw_valid=HW, tile_rows=tile_rows,
            inv_hw=1.0 / HW, needs_mask=needs_mask)
        out = pl.pallas_call(
            kernel,
            out_shape=jax.ShapeDtypeStruct((N, HWp, Cp), jnp.float32),
            grid_spec=pltpu.PrefetchScalarGridSpec(
                num_scalar_prefetch=0,
                grid=(N, R),
                in_specs=[patch_spec, w_spec],
                out_specs=pl.BlockSpec((1, HWp, Cp), lambda n, r: (n, 0, 0)),
                scratch_shapes=[pltpu.VMEM((1, Cp), jnp.float32),   # channel sum
                                pltpu.VMEM((1, Cp), jnp.float32)]), # channel sum sq
            compiler_params=cparams,
        )(patches, w)
    else:
        kernel_a = functools.partial(
            _conv_stats_kernel, hw_valid=HW, tile_rows=tile_rows,
            inv_hw=1.0 / HW, needs_mask=needs_mask)
        y, mean, scale = pl.pallas_call(
            kernel_a,
            out_shape=(jax.ShapeDtypeStruct((N, HWp, Cp), jnp.float32),
                       jax.ShapeDtypeStruct((N, 1, Cp), jnp.float32),
                       jax.ShapeDtypeStruct((N, 1, Cp), jnp.float32)),
            grid_spec=pltpu.PrefetchScalarGridSpec(
                num_scalar_prefetch=0,
                grid=(N, R),
                in_specs=[patch_spec, w_spec],
                out_specs=(pl.BlockSpec((1, tile_rows, Cp), lambda n, r: (n, r, 0)),
                           pl.BlockSpec((1, 1, Cp), lambda n, r: (n, 0, 0)),
                           pl.BlockSpec((1, 1, Cp), lambda n, r: (n, 0, 0))),
                scratch_shapes=[pltpu.VMEM((1, Cp), jnp.float32),
                                pltpu.VMEM((1, Cp), jnp.float32)]),
            compiler_params=cparams,
        )(patches, w)
        out = pl.pallas_call(
            _normalize_kernel,
            out_shape=jax.ShapeDtypeStruct((N, HWp, Cp), jnp.float32),
            grid_spec=pltpu.PrefetchScalarGridSpec(
                num_scalar_prefetch=0,
                grid=(N, R),
                in_specs=[pl.BlockSpec((1, tile_rows, Cp), lambda n, r: (n, r, 0)),
                          pl.BlockSpec((1, 1, Cp), lambda n, r: (n, 0, 0)),
                          pl.BlockSpec((1, 1, Cp), lambda n, r: (n, 0, 0))],
                out_specs=pl.BlockSpec((1, tile_rows, Cp), lambda n, r: (n, r, 0))),
            compiler_params=cparams,
            input_output_aliases={0: 0},        # normalize y in place (P8)
        )(y, mean, scale)

    # drop padding, back to NCHW (module semantics); keep NHWC if the consumer
    # allows to skip this transpose.
    out = out[:, :HW, :Cout].reshape(N, H, W, Cout)
    return jnp.transpose(out, (0, 3, 1, 2)).astype(x_nchw.dtype)


def _reference(x_nchw, w_oihw, bias, padding=1):
    y = jax.lax.conv_general_dilated(
        x_nchw, w_oihw, window_strides=(1, 1),
        padding=[(padding, padding), (padding, padding)],
        dimension_numbers=("NCHW", "OIHW", "NCHW"),
        precision=jax.lax.Precision.HIGHEST)
    y = y + bias.reshape(1, -1, 1, 1)
    y = jnp.maximum(y, 0.0)
    mean = y.mean(axis=(2, 3), keepdims=True)
    var = ((y - mean) ** 2).mean(axis=(2, 3), keepdims=True)
    return (y - mean) * jax.lax.rsqrt(var + EPS)


if __name__ == "__main__":
    N, Cin, Cout, H, W = 2, 4, 8, 16, 16
    key = jax.random.PRNGKey(0)
    kx, kw, kb = jax.random.split(key, 3)

    x = jax.random.normal(kx, (N, Cin, H, W), dtype=jnp.float32)
    # Deterministic synthetic parameters (shapes per nn.Conv2d(in, out, 3, padding=1)).
    weight = jax.random.normal(kw, (Cout, Cin, 3, 3), dtype=jnp.float32) * 0.1
    bias = jax.random.normal(kb, (Cout,), dtype=jnp.float32) * 0.1

    # reference sees the same bf16-rounded operands the kernel consumes
    xq = x.astype(jnp.bfloat16).astype(jnp.float32)
    wq = weight.astype(jnp.bfloat16).astype(jnp.float32)
    bq = bias.astype(jnp.bfloat16).astype(jnp.float32)
    ref = jax.block_until_ready(_reference(xq, wq, bq))

    # main (one-pass, VMEM-resident image) path
    out1 = jax.block_until_ready(conv_norm_forward(x, weight, bias))
    np.testing.assert_allclose(np.asarray(out1), np.asarray(ref), rtol=2e-3, atol=2e-3)

    # also exercise the streaming two-pass fallback (taken automatically when the
    # resident per-image output would not fit in VMEM, e.g. large images on v7x)
    out2 = jax.block_until_ready(
        conv_norm_forward(x, weight, bias, force_two_pass=True))
    np.testing.assert_allclose(np.asarray(out2), np.asarray(ref), rtol=2e-3, atol=2e-3)

    print("KERNEL_OK")
</pallas_src>

<mosaic_0001>
module attributes {stable_mosaic.version = 11 : i64} {
  func.func @_conv_norm_kernel(%arg0: i32, %arg1: i32, %arg2: memref<1x256x37xbf16, #tpu.memory_space<vmem>>, %arg3: memref<37x128xbf16, #tpu.memory_space<vmem>>, %arg4: memref<1x256x128xf32, #tpu.memory_space<vmem>>, %arg5: memref<1x128xf32, #tpu.memory_space<vmem>>, %arg6: memref<1x128xf32, #tpu.memory_space<vmem>>) attributes {dimension_semantics = [#tpu.dimension_semantics<parallel>, #tpu.dimension_semantics<arbitrary>], iteration_bounds = array<i64: 2, 1>, scalar_prefetch = 0 : i64, scratch_operands = 2 : i64, tpu.core_type = #tpu.core_type<tc>, window_params = [{transform_indices = @transform_0, window_bounds = array<i64: 1, 256, 37>}, {pipeline_mode = #tpu.pipeline_mode<synchronous>, transform_indices = @transform_1, window_bounds = array<i64: 37, 128>}, {transform_indices = @transform_2, window_bounds = array<i64: 1, 256, 128>}]} {
    %c0_i32 = arith.constant 0 : i32
    %0 = arith.cmpi eq, %arg1, %c0_i32 : i32
    %1 = arith.extui %0 : i1 to i32
    %c0_i32_0 = arith.constant 0 : i32
    %2 = arith.cmpi ne, %1, %c0_i32_0 : i32
    scf.if %2 {
      %cst_20 = arith.constant 0.000000e+00 : f32
      %29 = vector.broadcast %cst_20 : f32 to vector<1x128xf32>
      %c0_21 = arith.constant 0 : index
      %c0_22 = arith.constant 0 : index
      %30 = vector.load %arg5[%c0_21, %c0_22] : memref<1x128xf32, #tpu.memory_space<vmem>>, vector<1x128xf32>
      tpu.vector_store %arg5[%c0_21, %c0_22], %29 {strides = array<i32>} : memref<1x128xf32, #tpu.memory_space<vmem>>, vector<1x128xf32>,
      %cst_23 = arith.constant 0.000000e+00 : f32
      %31 = vector.broadcast %cst_23 : f32 to vector<1x128xf32>
      %c0_24 = arith.constant 0 : index
      %c0_25 = arith.constant 0 : index
      %32 = vector.load %arg6[%c0_24, %c0_25] : memref<1x128xf32, #tpu.memory_space<vmem>>, vector<1x128xf32>
      tpu.vector_store %arg6[%c0_24, %c0_25], %31 {strides = array<i32>} : memref<1x128xf32, #tpu.memory_space<vmem>>, vector<1x128xf32>,
    } else {
    }
    %c0 = arith.constant 0 : index
    %c0_1 = arith.constant 0 : index
    %c0_2 = arith.constant 0 : index
    %3 = vector.load %arg2[%c0, %c0_1, %c0_2] : memref<1x256x37xbf16, #tpu.memory_space<vmem>>, vector<1x256x37xbf16>
    %4 = vector.shape_cast %3 : vector<1x256x37xbf16> to vector<256x37xbf16>
    %c0_3 = arith.constant 0 : index
    %c0_4 = arith.constant 0 : index
    %5 = vector.load %arg3[%c0_3, %c0_4] : memref<37x128xbf16, #tpu.memory_space<vmem>>, vector<37x128xbf16>
    %cst = arith.constant dense<0.000000e+00> : vector<256x128xf32>
    %6 = tpu.matmul %4, %5, %cst {dimension_numbers = #tpu.dot_dimension_numbers<[1], [0], [0], [1], [0, 0, 1, 1], [], []>} : vector<256x37xbf16>, vector<37x128xbf16>, vector<256x128xf32> -> vector<256x128xf32>
    %cst_5 = arith.constant 0.000000e+00 : f32
    %7 = vector.broadcast %cst_5 : f32 to vector<256x128xf32>
    %8 = arith.maximumf %6, %7 : vector<256x128xf32>
    %c256_i32 = arith.constant 256 : i32
    %9 = arith.muli %arg1, %c256_i32 : i32
    %10 = tpu.assume_multiple %9, 256 : i32
    %c0_6 = arith.constant 0 : index
    %11 = arith.index_cast %10 : i32 to index
    %c0_7 = arith.constant 0 : index
    %12 = vector.load %arg4[%c0_6, %11, %c0_7] : memref<1x256x128xf32, #tpu.memory_space<vmem>>, vector<1x256x128xf32>
    %13 = vector.shape_cast %12 : vector<1x256x128xf32> to vector<256x128xf32>
    %14 = vector.shape_cast %8 : vector<256x128xf32> to vector<1x256x128xf32>
    tpu.vector_store %arg4[%c0_6, %11, %c0_7], %14 {strides = array<i32>} : memref<1x256x128xf32, #tpu.memory_space<vmem>>, vector<1x256x128xf32>,
    %c0_8 = arith.constant 0 : index
    %c0_9 = arith.constant 0 : index
    %15 = vector.load %arg5[%c0_8, %c0_9] : memref<1x128xf32, #tpu.memory_space<vmem>>, vector<1x128xf32>
    %cst_10 = arith.constant dense<0.000000e+00> : vector<128xf32>
    %16 = vector.multi_reduction <add>, %8, %cst_10 [0] : vector<256x128xf32> to vector<128xf32>
    %17 = vector.shape_cast %16 : vector<128xf32> to vector<1x128xf32>
    %18 = arith.addf %15, %17 : vector<1x128xf32>
    %c0_11 = arith.constant 0 : index
    %c0_12 = arith.constant 0 : index
    %19 = vector.load %arg5[%c0_11, %c0_12] : memref<1x128xf32, #tpu.memory_space<vmem>>, vector<1x128xf32>
    tpu.vector_store %arg5[%c0_11, %c0_12], %18 {strides = array<i32>} : memref<1x128xf32, #tpu.memory_space<vmem>>, vector<1x128xf32>,
    %c0_13 = arith.constant 0 : index
    %c0_14 = arith.constant 0 : index
    %20 = vector.load %arg6[%c0_13, %c0_14] : memref<1x128xf32, #tpu.memory_space<vmem>>, vector<1x128xf32>
    %21 = arith.mulf %8, %8 : vector<256x128xf32>
    %cst_15 = arith.constant dense<0.000000e+00> : vector<128xf32>
    %22 = vector.multi_reduction <add>, %21, %cst_15 [0] : vector<256x128xf32> to vector<128xf32>
    %23 = vector.shape_cast %22 : vector<128xf32> to vector<1x128xf32>
    %24 = arith.addf %20, %23 : vector<1x128xf32>
    %c0_16 = arith.constant 0 : index
    %c0_17 = arith.constant 0 : index
    %25 = vector.load %arg6[%c0_16, %c0_17] : memref<1x128xf32, #tpu.memory_space<vmem>>, vector<1x128xf32>
    tpu.vector_store %arg6[%c0_16, %c0_17], %24 {strides = array<i32>} : memref<1x128xf32, #tpu.memory_space<vmem>>, vector<1x128xf32>,
    %c0_i32_18 = arith.constant 0 : i32
    %26 = arith.cmpi eq, %arg1, %c0_i32_18 : i32
    %27 = arith.extui %26 : i1 to i32
    %c0_i32_19 = arith.constant 0 : i32
    %28 = arith.cmpi ne, %27, %c0_i32_19 : i32
    scf.if %28 {
      %c0_20 = arith.constant 0 : index
      %c0_21 = arith.constant 0 : index
      %29 = vector.load %arg5[%c0_20, %c0_21] : memref<1x128xf32, #tpu.memory_space<vmem>>, vector<1x128xf32>
      %cst_22 = arith.constant 3.906250e-03 : f32
      %30 = vector.broadcast %cst_22 : f32 to vector<1x128xf32>
      %31 = arith.mulf %29, %30 : vector<1x128xf32>
      %c0_23 = arith.constant 0 : index
      %c0_24 = arith.constant 0 : index
      %32 = vector.load %arg6[%c0_23, %c0_24] : memref<1x128xf32, #tpu.memory_space<vmem>>, vector<1x128xf32>
      %cst_25 = arith.constant 3.906250e-03 : f32
      %33 = vector.broadcast %cst_25 : f32 to vector<1x128xf32>
      %34 = arith.mulf %32, %33 : vector<1x128xf32>
      %35 = arith.mulf %31, %31 : vector<1x128xf32>
      %36 = arith.subf %34, %35 : vector<1x128xf32>
      %cst_26 = arith.constant 0.000000e+00 : f32
      %37 = vector.broadcast %cst_26 : f32 to vector<1x128xf32>
      %38 = arith.maximumf %36, %37 : vector<1x128xf32>
      %cst_27 = arith.constant 9.99999974E-6 : f32
      %39 = vector.broadcast %cst_27 : f32 to vector<1x128xf32>
      %40 = arith.addf %38, %39 : vector<1x128xf32>
      %41 = math.rsqrt %40 : vector<1x128xf32>
      %c0_i32_28 = arith.constant 0 : i32
      %c256_i32_29 = arith.constant 256 : i32
      %42 = arith.muli %c0_i32_28, %c256_i32_29 : i32
      %43 = tpu.assume_multiple %42, 256 : i32
      %c0_30 = arith.constant 0 : index
      %44 = arith.index_cast %43 : i32 to index
      %c0_31 = arith.constant 0 : index
      %45 = vector.load %arg4[%c0_30, %44, %c0_31] : memref<1x256x128xf32, #tpu.memory_space<vmem>>, vector<1x256x128xf32>
      %46 = vector.shape_cast %45 : vector<1x256x128xf32> to vector<256x128xf32>
      %47 = vector.broadcast %31 : vector<1x128xf32> to vector<256x128xf32>
      %48 = arith.subf %46, %47 : vector<256x128xf32>
      %49 = vector.broadcast %41 : vector<1x128xf32> to vector<256x128xf32>
      %50 = arith.mulf %48, %49 : vector<256x128xf32>
      %c0_32 = arith.constant 0 : index
      %51 = arith.index_cast %43 : i32 to index
      %c0_33 = arith.constant 0 : index
      %52 = vector.load %arg4[%c0_32, %51, %c0_33] : memref<1x256x128xf32, #tpu.memory_space<vmem>>, vector<1x256x128xf32>
      %53 = vector.shape_cast %52 : vector<1x256x128xf32> to vector<256x128xf32>
      %54 = vector.shape_cast %50 : vector<256x128xf32> to vector<1x256x128xf32>
      tpu.vector_store %arg4[%c0_32, %51, %c0_33], %54 {strides = array<i32>} : memref<1x256x128xf32, #tpu.memory_space<vmem>>, vector<1x256x128xf32>,
      %c1_i32 = arith.constant 1 : i32
    } else {
    }
    return
  }
  func.func @transform_0(%arg0: i32, %arg1: i32) -> (i32, i32, i32) {
    %c0_i32 = arith.constant 0 : i32
    %c0_i32_0 = arith.constant 0 : i32
    return %arg0, %arg1, %c0_i32 : i32, i32, i32
  }
  func.func @transform_1(%arg0: i32, %arg1: i32) -> (i32, i32) {
    %c0_i32 = arith.constant 0 : i32
    %c0_i32_0 = arith.constant 0 : i32
    %c0_i32_1 = arith.constant 0 : i32
    return %c0_i32, %c0_i32_0 : i32, i32
  }
  func.func @transform_2(%arg0: i32, %arg1: i32) -> (i32, i32, i32) {
    %c0_i32 = arith.constant 0 : i32
    %c0_i32_0 = arith.constant 0 : i32
    %c0_i32_1 = arith.constant 0 : i32
    return %arg0, %c0_i32, %c0_i32_0 : i32, i32, i32
  }
}

</mosaic_0001>

<bundles_post_ra>
// kernel: conv_norm_forward.1
= control target key start
LH: loop header
LB: loop body
LE: loop exit
PB: predicated region body
PF: predicated region fallthrough
CT: control target
= control target key end

     0   :  { %s1128_s9 = smov 0   ;;  %s1130_s10 = smov 0   ;;  %s1498_s0 = inlined_call_operand.vmem [shape: bf16[2,256,37], index: 0, kind: input, shape index: {}]   ;;  %s1499_s1 = inlined_call_operand.vmem [shape: bf16[37,128], index: 1, kind: input, shape index: {}]   ;;  %s1500_s2 = inlined_call_operand.vmem [shape: f32[2,256,128], index: 2, kind: output, shape index: {}]  }
   0x1   :  { %s1132_s11 = smov 0  }
   0x2 LB: > { %s24_s12 = sadd.s32 1, %s1105_s10  ;;  %p933_p0 = scmp.ge.s32.totalorder %s1109_s11, 1  ;;  %s1109_s11 = sphi %s1132_s11, %s12_s11   ;;  %s1105_s10 = sphi %s1130_s10, %s1502_s10   ;;  %s1101_s9 = sphi %s1128_s9, %s1501_s9  }
   0x3   : > { %p26_p1 = scmp.ge.s32.totalorder %s24_s12, 2  ;;  %p131_p2 = scmp.lt.s32.totalorder %s1109_s11, 3 }
   0x5   : > { %s1504_s12 = smov (%p26_p1, %s24_s12), 0  ;;  %p132_p3 = pnand %p933_p0, %p131_p2 }
   0x6   : > { %v1066_v0 = vld [vmem:[%s1499_s1] sm:$0xff] (!%p132_p3)   ;;  %vm360_vm0 = vcmask (!%p132_p3), 1041408   ;;  %v1067_v1 = vld [vmem:[%s1499_s1 + $0x8] sm:$0xff] (!%p132_p3)   ;;  %vm361_vm1 = vcmask (!%p132_p3), 1042432   ;;  %v1111_v3 = vmov (!%p132_p3), 65535   ;;  %p158_p4 = scmp.lt.s32.totalorder (!%p132_p3), %s1101_s9, 1 }
   0x7   : > { %135 = sbr.rel (%p132_p3) target bundleno = 362 (0x16a), region = 28  ;;  %996 = vmatprep.subr.bf16.mxu0 (!%p132_p3), %v1066_v0  ;;  %v1068_v2 = vld [vmem:[%s1499_s1 + $0x10] ss:$0 sps:$4 sm:$0x77] (!%p132_p3)   ;;  %1034 = vmatprep.subr.bf16.mxu1 (!%p132_p3), %v1066_v0  ;;  %v362_v4 = vsel (!%p132_p3), %vm360_vm0, 4294967295, %v1111_v3  ;;  %vm311_vm2 = vcmask (!%p132_p3), 302080  }
   0x8   : > { %997 = vmatpush3.bf16.msra.mxu0 (!%p132_p3), %v1066_v0  ;;  %1037 = vmatpush3.bf16.msra.mxu1 (!%p132_p3), %v1066_v0  ;;  %v363_v5 = vsel (!%p132_p3), %vm361_vm1, %v362_v4, 0  ;;  %v1112_v23 = vmov (!%p132_p3), 0.0  }
   0x9   : > { %998 = vmatprep.subr.bf16.mxu0 (!%p132_p3), %v1067_v1  ;;  %1035 = vmatprep.subr.bf16.mxu1 (!%p132_p3), %v1067_v1  ;;  %v365_v6 = vand.u32 (!%p132_p3), %v1068_v2, %v363_v5  ;;  %177 = vst [vmem:[#allocation2] sm:$0x1] (!%p132_p3), %v1112_v23  ;;  %178 = vst [vmem:[#allocation3] sm:$0x1] (!%p132_p3), %v1112_v23 }
   0xc   : > { %999 = vmatpush3.bf16.msra.mxu0 (!%p132_p3), %v1067_v1  ;;  %1038 = vmatpush3.bf16.msra.mxu1 (!%p132_p3), %v1067_v1 }
   0xd   : > { %1000 = vmatprep.subr.bf16.mxu0 (!%p132_p3), %v365_v6  ;;  %1036 = vmatprep.subr.bf16.mxu1 (!%p132_p3), %v365_v6 }
   0xe   : > { %s1506_s9 = smov (!%p158_p4, %s1101_s9), 1 }
   0xf   : > { %s975_s19 = sshll.u32 %s1506_s9, 7  ;;  %s976_s23 = sshll.u32 %s1506_s9, 8 }
  0x10   : > { %s1161_s22 = scalar_lea.vmem %s1498_s0, %s975_s19  ;;  %1001 = vmatpush3.bf16.msra.mxu0 %v365_v6  ;;  %1039 = vmatpush3.bf16.msra.mxu1 %v365_v6  ;;  %s1447_s26 = scalar_lea.vmem %s1500_s2, %s976_s23 }
  0x11   : > { %v1069_v7 = vld [vmem:[%s1161_s22] sm:$0xff]   ;;  %v1070_v8 = vld [vmem:[%s1161_s22 + $0x8] sm:$0xff]   ;;  %v1071_v9 = vld [vmem:[%s1161_s22 + $0x10] sm:$0xff]  }
  0x12   : > { %1002 = vmatprep.mubr.msk.bf16.mxu0 %vm311_vm2, %v1069_v7  ;;  %v1072_v10 = vld [vmem:[%s1161_s22 + $0x18] sm:$0xff]   ;;  %v1073_v11 = vld [vmem:[%s1161_s22 + $0x20] sm:$0xff]   ;;  %v1078_v13 = vld [vmem:[%s1161_s22 + $0x48] sm:$0xff]  }
  0x13   : > { %1003 = vmatmul.mubr.msk.bf16.vlgmr.msra.gmra.mrb[0].mxu0 %vm311_vm2, %v1070_v8  ;;  %v1077_v12 = vld [vmem:[%s1161_s22 + $0x40] sm:$0xff]   ;;  %v1079_v14 = vld [vmem:[%s1161_s22 + $0x50] sm:$0xff]   ;;  %v1080_v15 = vld [vmem:[%s1161_s22 + $0x58] sm:$0xff]  }
  0x14   : > { %1006 = vmatprep.mubr.msk.bf16.mxu0 %vm311_vm2, %v1071_v9  ;;  %1018 = vmatprep.mubr.msk.bf16.mxu1 %vm311_vm2, %v1077_v12  ;;  %v1081_v16 = vld [vmem:[%s1161_s22 + $0x60] sm:$0xff]   ;;  %v1074_v17 = vld [vmem:[%s1161_s22 + $0x28] sm:$0xff]   ;;  %v1075_v18 = vld [vmem:[%s1161_s22 + $0x30] sm:$0xff]  }
  0x15   : > { %1019 = vmatmul.mubr.msk.bf16.vlgmr.msra.gmra.mrb[0].mxu1 %vm311_vm2, %v1078_v13  ;;  %v1082_v19 = vld [vmem:[%s1161_s22 + $0x68] sm:$0xff]   ;;  %v1083_v20 = vld [vmem:[%s1161_s22 + $0x70] sm:$0xff]   ;;  %v1076_v21 = vld [vmem:[%s1161_s22 + $0x38] sm:$0xff]  }
  0x16   : > { %1022 = vmatprep.mubr.msk.bf16.mxu1 %vm311_vm2, %v1079_v14  ;;  %v1084_v22 = vld [vmem:[%s1161_s22 + $0x78] sm:$0xff]  }
  0x1b   : > { %1007 = vmatmul.mubr.msk.bf16.gmra.mrb[4].mxu0 %vm311_vm2, %v1072_v10 }
  0x1c   : > { %1010 = vmatprep.mubr.msk.bf16.mxu0 %vm311_vm2, %v1073_v11 }
  0x1d   : > { %1023 = vmatmul.mubr.msk.bf16.gmra.mrb[4].mxu1 %vm311_vm2, %v1080_v15 }
  0x1e   : > { %1026 = vmatprep.mubr.msk.bf16.mxu1 %vm311_vm2, %v1081_v16 }
  0x23   : > { %1011 = vmatmul.mubr.msk.bf16.gmra.mrb[8].mxu0 %vm311_vm2, %v1074_v17 }
  0x24   : > { %1014 = vmatprep.mubr.msk.bf16.mxu0 %vm311_vm2, %v1075_v18 }
  0x25   : > { %1027 = vmatmul.mubr.msk.bf16.gmra.mrb[8].mxu1 %vm311_vm2, %v1082_v19 }
  0x26   : > { %1030 = vmatprep.mubr.msk.bf16.mxu1 %vm311_vm2, %v1083_v20 }
  0x2b   : > { %1015 = vmatmul.mubr.msk.bf16.gmra.mrb[12].mxu0 %vm311_vm2, %v1076_v21 }
  0x2d   : > { %1031 = vmatmul.mubr.msk.bf16.gmra.mrb[12].mxu1 %vm311_vm2, %v1084_v22 }
  0xe6   : > { %v1004_v24 = vpop.f32.mrb[0].mxu0 }
  0xe7   : > { %v401_v25 = vpop.f32.mrb[1].mxu0  ;;  %v1197_v29 = vmax.f32 %v1004_v24, 0.0 }
  0xe8   : > { %v1195_v26 = vmax.f32 %v401_v25, 0.0  ;;  %v1005_v27 = vpop.f32.mrb[2].mxu0  ;;  %v1209_v35 = vpop.f32.mrb[0].mxu1 }
  0xe9   : > { %v404_v28 = vpop.f32.mrb[3].mxu0  ;;  %v1203_v32 = vmax.f32 %v1005_v27, 0.0  ;;  %v1211_v36 = vpop.f32.mrb[1].mxu1  ;;  %v637_v37 = vmul.f32 %v1197_v29, %v1197_v29 }
  0xea   : > { %v1199_v30 = vmax.f32 %v404_v28, 0.0  ;;  %v635_v31 = vmul.f32 %v1195_v26, %v1195_v26  ;;  %v1216_v41 = vpop.f32.mrb[2].mxu1 }
  0xeb   : > { %v1218_v43 = vpop.f32.mrb[3].mxu1  ;;  %v638_v44 = vmul.f32 %v1203_v32, %v1203_v32 }
  0xec   : > { %v595_v33 = vadd.f32 %v1199_v30, %v1195_v26  ;;  %v636_v34 = vmul.f32 %v1199_v30, %v1199_v30 }
  0xee   : > { %v596_v38 = vadd.f32 %v595_v33, %v1197_v29  ;;  %v667_v39 = vadd.f32 %v636_v34, %v635_v31  ;;  %v1008_v40 = vpop.f32.mrb[4].mxu0 }
  0xef   : > { %v417_v42 = vpop.f32.mrb[5].mxu0  ;;  %v1225_v49 = vmax.f32 %v1008_v40, 0.0 }
  0xf0   : > { %v668_v45 = vadd.f32 %v667_v39, %v637_v37  ;;  %v1222_v46 = vmax.f32 %v417_v42, 0.0  ;;  %v597_v47 = vadd.f32 %v596_v38, %v1203_v32  ;;  %v1009_v48 = vpop.f32.mrb[6].mxu0  ;;  %v1237_v59 = vpop.f32.mrb[4].mxu1 }
  0xf1   : > { %v420_v50 = vpop.f32.mrb[7].mxu0  ;;  %v1232_v56 = vmax.f32 %v1009_v48, 0.0  ;;  %v1239_v60 = vpop.f32.mrb[5].mxu1  ;;  %v641_v61 = vmul.f32 %v1225_v49, %v1225_v49  ;;  %v1285_v48 = vmax.f32 %v1211_v36, 0.0 }
  0xf2   : > { %v598_v51 = vadd.f32 %v597_v47, %v1222_v46  ;;  %v639_v52 = vmul.f32 %v1222_v46, %v1222_v46  ;;  %v669_v53 = vadd.f32 %v668_v45, %v638_v44  ;;  %v1230_v54 = vmax.f32 %v420_v50, 0.0  ;;  %v1244_v1 = vpop.f32.mrb[6].mxu1 }
  0xf3   : > { %v1246_v3 = vpop.f32.mrb[7].mxu1  ;;  %v642_v4 = vmul.f32 %v1232_v56, %v1232_v56  ;;  %v651_v36 = vmul.f32 %v1285_v48, %v1285_v48 }
  0xf4   : > { %v670_v55 = vadd.f32 %v669_v53, %v639_v52  ;;  %v599_v57 = vadd.f32 %v598_v51, %v1230_v54  ;;  %v640_v58 = vmul.f32 %v1230_v54, %v1230_v54 }
  0xf6   : > { %v600_v62 = vadd.f32 %v599_v57, %v1225_v49  ;;  %v671_v63 = vadd.f32 %v670_v55, %v640_v58  ;;  %v1012_v0 = vpop.f32.mrb[8].mxu0 }
  0xf7   : > { %v433_v2 = vpop.f32.mrb[9].mxu0  ;;  %v1253_v9 = vmax.f32 %v1012_v0, 0.0 }
  0xf8   : > { %v672_v5 = vadd.f32 %v671_v63, %v641_v61  ;;  %v1250_v6 = vmax.f32 %v433_v2, 0.0  ;;  %v601_v7 = vadd.f32 %v600_v62, %v1232_v56  ;;  %v1013_v8 = vpop.f32.mrb[10].mxu0  ;;  %v1265_v19 = vpop.f32.mrb[8].mxu1 }
  0xf9   : > { %v436_v10 = vpop.f32.mrb[11].mxu0  ;;  %v1260_v16 = vmax.f32 %v1013_v8, 0.0  ;;  %v497_v20 = vpop.f32.mrb[9].mxu1  ;;  %v645_v21 = vmul.f32 %v1253_v9, %v1253_v9  ;;  %v1304_v8 = vmax.f32 %v1209_v35, 0.0 }
  0xfa   : > { %v602_v11 = vadd.f32 %v601_v7, %v1250_v6  ;;  %v643_v12 = vmul.f32 %v1250_v6, %v1250_v6  ;;  %v673_v13 = vadd.f32 %v672_v5, %v642_v4  ;;  %v1258_v14 = vmax.f32 %v436_v10, 0.0  ;;  %v1270_v25 = vpop.f32.mrb[10].mxu1 }
  0xfb   : > { %v500_v28 = vpop.f32.mrb[11].mxu1  ;;  %v646_v31 = vmul.f32 %v1260_v16, %v1260_v16  ;;  %v1301_v7 = vmax.f32 %v1218_v43, 0.0  ;;  %v653_v43 = vmul.f32 %v1304_v8, %v1304_v8 }
  0xfc   : > { %v674_v15 = vadd.f32 %v673_v13, %v643_v12  ;;  %v603_v17 = vadd.f32 %v602_v11, %v1258_v14  ;;  %v644_v18 = vmul.f32 %v1258_v14, %v1258_v14  ;;  %v1308_v12 = vmax.f32 %v1216_v41, 0.0 }
  0xfe   : > { %v604_v22 = vadd.f32 %v603_v17, %v1253_v9  ;;  %v675_v23 = vadd.f32 %v674_v15, %v644_v18  ;;  %v1016_v24 = vpop.f32.mrb[12].mxu0  ;;  %v652_v17 = vmul.f32 %v1301_v7, %v1301_v7  ;;  %v1314_v18 = vmax.f32 %v1239_v60, 0.0 }
  0xff   : > { %v449_v27 = vpop.f32.mrb[13].mxu0  ;;  %v1277_v39 = vmax.f32 %v1016_v24, 0.0  ;;  %v1328_v60 = vmax.f32 %v1237_v59, 0.0 }
 0x100   : > { %v676_v33 = vadd.f32 %v675_v23, %v645_v21  ;;  %v1274_v34 = vmax.f32 %v449_v27, 0.0  ;;  %v605_v37 = vadd.f32 %v604_v22, %v1260_v16  ;;  %v1017_v38 = vpop.f32.mrb[14].mxu0  ;;  %v1032_v55 = vpop.f32.mrb[12].mxu1  ;;  %v654_v22 = vmul.f32 %v1308_v12, %v1308_v12 }
 0x101   : > { %v452_v40 = vpop.f32.mrb[15].mxu0  ;;  %v1287_v51 = vmax.f32 %v1017_v38, 0.0  ;;  %v513_v57 = vpop.f32.mrb[13].mxu1  ;;  %v649_v58 = vmul.f32 %v1277_v39, %v1277_v39  ;;  %v655_v24 = vmul.f32 %v1314_v18, %v1314_v18  ;;  %v1325_v27 = vmax.f32 %v1246_v3, 0.0 }
 0x102   : > { %v606_v42 = vadd.f32 %v605_v37, %v1274_v34  ;;  %v647_v44 = vmul.f32 %v1274_v34, %v1274_v34  ;;  %v677_v45 = vadd.f32 %v676_v33, %v646_v31  ;;  %v1282_v47 = vmax.f32 %v452_v40, 0.0  ;;  %v1033_v63 = vpop.f32.mrb[14].mxu1 }
 0x103   : > { %v516_v0 = vpop.f32.mrb[15].mxu1  ;;  %v650_v2 = vmul.f32 %v1287_v51, %v1287_v51  ;;  %v1332_v37 = vmax.f32 %v1244_v1, 0.0  ;;  %v657_v3 = vmul.f32 %v1328_v60, %v1328_v60 }
 0x104   : > { %v678_v50 = vadd.f32 %v677_v45, %v647_v44  ;;  %v607_v52 = vadd.f32 %v606_v42, %v1282_v47  ;;  %v648_v53 = vmul.f32 %v1282_v47, %v1282_v47  ;;  %v656_v42 = vmul.f32 %v1325_v27, %v1325_v27 }
 0x105   : > { %v1337_v44 = vmax.f32 %v497_v20, 0.0  ;;  %v1350_v20 = vmax.f32 %v1265_v19, 0.0 }
 0x106   : > { %v608_v61 = vadd.f32 %v607_v52, %v1277_v39  ;;  %v679_v62 = vadd.f32 %v678_v50, %v648_v53  ;;  %v658_v50 = vmul.f32 %v1332_v37, %v1332_v37 }
 0x107   : > { %v659_v53 = vmul.f32 %v1337_v44, %v1337_v44 }
 0x108   : > { %v680_v4 = vadd.f32 %v679_v62, %v649_v58  ;;  %v609_v5 = vadd.f32 %v608_v61, %v1287_v51  ;;  %v1347_v58 = vmax.f32 %v500_v28, 0.0  ;;  %v661_v28 = vmul.f32 %v1350_v20, %v1350_v20 }
 0x10a   : > { %v610_v10 = vadd.f32 %v609_v5, %v1285_v48  ;;  %v681_v11 = vadd.f32 %v680_v4, %v650_v2  ;;  %v660_v5 = vmul.f32 %v1347_v58, %v1347_v58 }
 0x10c   : > { %v682_v13 = vadd.f32 %v681_v11, %v651_v36  ;;  %v611_v15 = vadd.f32 %v610_v10, %v1301_v7  ;;  %v1354_v36 = vmax.f32 %v1270_v25, 0.0  ;;  %v1359_v10 = vmax.f32 %v513_v57, 0.0 }
 0x10e   : > { %v612_v35 = vadd.f32 %v611_v15, %v1304_v8  ;;  %v683_v21 = vadd.f32 %v682_v13, %v652_v17  ;;  %v662_v13 = vmul.f32 %v1354_v36, %v1354_v36  ;;  %v663_v17 = vmul.f32 %v1359_v10, %v1359_v10 }
 0x110   : > { %v684_v41 = vadd.f32 %v683_v21, %v653_v43  ;;  %v613_v23 = vadd.f32 %v612_v35, %v1308_v12  ;;  %v1369_v43 = vmax.f32 %v516_v0, 0.0  ;;  %v1371_v35 = vmax.f32 %v1032_v55, 0.0 }
 0x112   : > { %v614_v31 = vadd.f32 %v613_v23, %v1314_v18  ;;  %v685_v33 = vadd.f32 %v684_v41, %v654_v22  ;;  %v1374_v41 = vmax.f32 %v1033_v63, 0.0 }
 0x114   : > { %v686_v38 = vadd.f32 %v685_v33, %v655_v24  ;;  %v615_v40 = vadd.f32 %v614_v31, %v1325_v27  ;;  %v664_v24 = vmul.f32 %v1369_v43, %v1369_v43  ;;  %v665_v31 = vmul.f32 %v1371_v35, %v1371_v35 }
 0x115   : > { %v666_v55 = vmul.f32 %v1374_v41, %v1374_v41 }
 0x116   : > { %v616_v59 = vadd.f32 %v615_v40, %v1328_v60  ;;  %v687_v45 = vadd.f32 %v686_v38, %v656_v42 }
 0x118   : > { %v688_v52 = vadd.f32 %v687_v45, %v657_v3  ;;  %v617_v1 = vadd.f32 %v616_v59, %v1332_v37 }
 0x11a   : > { %v618_v61 = vadd.f32 %v617_v1, %v1337_v44  ;;  %v689_v62 = vadd.f32 %v688_v52, %v658_v50 }
 0x11c   : > { %v690_v2 = vadd.f32 %v689_v62, %v659_v53  ;;  %v619_v4 = vadd.f32 %v618_v61, %v1347_v58  ;;  %v594_v62 = vld [vmem:[#allocation2] sm:$0x1] }
 0x11e   : > { %v620_v19 = vadd.f32 %v619_v4, %v1350_v20  ;;  %v691_v11 = vadd.f32 %v690_v2, %v660_v5  ;;  %v634_v5 = vld [vmem:[#allocation3] sm:$0x1] }
 0x120   : > { %v692_v15 = vadd.f32 %v691_v11, %v661_v28  ;;  %v621_v25 = vadd.f32 %v620_v19, %v1354_v36 }
 0x122   : > { %v622_v57 = vadd.f32 %v621_v25, %v1359_v10  ;;  %v693_v21 = vadd.f32 %v692_v15, %v662_v13  ;;  %v751_v13 = vlaneseq }
 0x124   : > { %v694_v22 = vadd.f32 %v693_v21, %v663_v17  ;;  %v623_v23 = vadd.f32 %v622_v57, %v1369_v43 }
 0x126   : > { %v624_v33 = vadd.f32 %v623_v23, %v1371_v35  ;;  %v695_v0 = vadd.f32 %v694_v22, %v664_v24  ;;  %v752_v22 = vshrl.u32 %v751_v13, 7 }
 0x128   : > { %v625_v38 = vadd.f32 %v624_v33, %v1374_v41  ;;  %v696_v40 = vadd.f32 %v695_v0, %v665_v31  ;;  %v753_v31 = vsub.s32 0, %v752_v22 }
 0x12a   : > { %v626_v42 = vrot.slane %v625_v38, 4  ;;  %v697_v63 = vadd.f32 %v696_v40, %v666_v55 }
 0x12c   : > { %v627_v3 = vadd.f32 %v626_v42, %v625_v38  ;;  %v698_v59 = vrot.slane %v697_v63, 4 }
 0x12e   : > { %v628_v45 = vrot.slane %v627_v3, 2  ;;  %v699_v50 = vadd.f32 %v698_v59, %v697_v63 }
 0x130   : > { %v629_v52 = vadd.f32 %v628_v45, %v627_v3  ;;  %v700_v1 = vrot.slane %v699_v50, 2 }
 0x132   : > { %v630_v53 = vrot.slane %v629_v52, 1  ;;  %v701_v61 = vadd.f32 %v700_v1, %v699_v50 }
 0x134   : > { %v631_v2 = vadd.f32 %v630_v53, %v629_v52  ;;  %v702_v4 = vrot.slane %v701_v61, 1 }
 0x136   : > { %v632_v28 = vadd.f32 %v631_v2, %v594_v62  ;;  %v703_v19 = vadd.f32 %v702_v4, %v701_v61 }
 0x138   : > { %633 = vst [vmem:[#allocation2] sm:$0x1] %v632_v28  ;;  %v704_v11 = vadd.f32 %v703_v19, %v634_v5 }
 0x13a   : > { %705 = vst [vmem:[#allocation3] sm:$0x1] %v704_v11 }
 0x13f   : > { %v709_v15 = vld [vmem:[#allocation2] sm:$0x1] }
 0x140   : > { %v710_v25 = vmul.f32 0.00390625, %v709_v15 }
 0x141   : > { %v711_v17 = vld [vmem:[#allocation3] sm:$0x1] }
 0x142   : > { %v712_v57 = vmul.f32 0.00390625, %v711_v17  ;;  %v713_v21 = vmul.f32 %v710_v25, %v710_v25  ;;  %v1385_v0 = vrot.slane %v710_v25, %v753_v31 }
 0x144   : > { %v714_v23 = vsub.f32 %v712_v57, %v713_v21  ;;  %v756_v55 = vsub.f32 %v1195_v26, %v1385_v0  ;;  %v757_v38 = vsub.f32 %v1199_v30, %v1385_v0  ;;  %v758_v40 = vsub.f32 %v1197_v29, %v1385_v0 }
 0x145   : > { %v759_v42 = vsub.f32 %v1203_v32, %v1385_v0  ;;  %v760_v63 = vsub.f32 %v1222_v46, %v1385_v0  ;;  %v761_v3 = vsub.f32 %v1230_v54, %v1385_v0  ;;  %v762_v59 = vsub.f32 %v1225_v49, %v1385_v0 }
 0x146   : > { %v715_v24 = vmax.f32 %v714_v23, 0.0  ;;  %v763_v26 = vsub.f32 %v1232_v56, %v1385_v0  ;;  %v764_v30 = vsub.f32 %v1250_v6, %v1385_v0  ;;  %v765_v29 = vsub.f32 %v1258_v14, %v1385_v0 }
 0x147   : > { %v766_v32 = vsub.f32 %v1253_v9, %v1385_v0  ;;  %v767_v46 = vsub.f32 %v1260_v16, %v1385_v0  ;;  %v768_v54 = vsub.f32 %v1274_v34, %v1385_v0  ;;  %v769_v49 = vsub.f32 %v1282_v47, %v1385_v0 }
 0x148   : > { %v716_v33 = vadd.f32 1e-05, %v715_v24  ;;  %v770_v56 = vsub.f32 %v1277_v39, %v1385_v0  ;;  %v771_v6 = vsub.f32 %v1287_v51, %v1385_v0  ;;  %v772_v14 = vsub.f32 %v1285_v48, %v1385_v0 }
 0x149   : > { %v773_v9 = vsub.f32 %v1301_v7, %v1385_v0  ;;  %v774_v16 = vsub.f32 %v1304_v8, %v1385_v0  ;;  %v775_v34 = vsub.f32 %v1308_v12, %v1385_v0  ;;  %v776_v47 = vsub.f32 %v1314_v18, %v1385_v0 }
 0x14a   : > { %1085 = vrsqrt.f32 %v716_v33  ;;  %v777_v51 = vsub.f32 %v1325_v27, %v1385_v0  ;;  %v778_v48 = vsub.f32 %v1328_v60, %v1385_v0  ;;  %v779_v45 = vsub.f32 %v1332_v37, %v1385_v0 }
 0x14b   : > { %v780_v7 = vsub.f32 %v1337_v44, %v1385_v0  ;;  %v781_v8 = vsub.f32 %v1347_v58, %v1385_v0  ;;  %v782_v12 = vsub.f32 %v1350_v20, %v1385_v0  ;;  %v783_v18 = vsub.f32 %v1354_v36, %v1385_v0 }
 0x14c   : > { %v784_v27 = vsub.f32 %v1359_v10, %v1385_v0  ;;  %v785_v60 = vsub.f32 %v1369_v43, %v1385_v0  ;;  %v786_v37 = vsub.f32 %v1371_v35, %v1385_v0  ;;  %v787_v44 = vsub.f32 %v1374_v41, %v1385_v0 }
 0x154   : > { %v1086_v39 = vpop.eup %1085 }
 0x155   : > { %v792_v50 = vrot.slane %v1086_v39, %v753_v31 }
 0x157   : > { %v794_v58 = vmul.f32 %v792_v50, %v756_v55  ;;  %v795_v20 = vmul.f32 %v792_v50, %v757_v38  ;;  %v796_v36 = vmul.f32 %v792_v50, %v758_v40  ;;  %v797_v52 = vmul.f32 %v792_v50, %v759_v42 }
 0x158   : > { %v798_v1 = vmul.f32 %v792_v50, %v760_v63  ;;  %v799_v10 = vmul.f32 %v792_v50, %v761_v3  ;;  %v800_v53 = vmul.f32 %v792_v50, %v762_v59  ;;  %v801_v43 = vmul.f32 %v792_v50, %v763_v26 }
 0x159   : > { %v802_v61 = vmul.f32 %v792_v50, %v764_v30  ;;  %v803_v62 = vmul.f32 %v792_v50, %v765_v29  ;;  %v804_v35 = vmul.f32 %v792_v50, %v766_v32  ;;  %v805_v2 = vmul.f32 %v792_v50, %v767_v46  ;;  %826 = vst [vmem:[%s1447_s26] sm:$0xff] %v794_v58 }
 0x15a   : > { %827 = vst [vmem:[%s1447_s26 + $0x8] sm:$0xff] %v795_v20  ;;  %828 = vst [vmem:[%s1447_s26 + $0x10] sm:$0xff] %v796_v36  ;;  %v806_v41 = vmul.f32 %v792_v50, %v768_v54  ;;  %v807_v4 = vmul.f32 %v792_v50, %v769_v49  ;;  %v808_v5 = vmul.f32 %v792_v50, %v770_v56 }
 0x15b   : > { %829 = vst [vmem:[%s1447_s26 + $0x18] sm:$0xff] %v797_v52  ;;  %v809_v28 = vmul.f32 %v792_v50, %v771_v6  ;;  %830 = vst [vmem:[%s1447_s26 + $0x20] sm:$0xff] %v798_v1  ;;  %v810_v19 = vmul.f32 %v792_v50, %v772_v14  ;;  %v811_v11 = vmul.f32 %v792_v50, %v773_v9 }
 0x15c   : > { %831 = vst [vmem:[%s1447_s26 + $0x28] sm:$0xff] %v799_v10  ;;  %832 = vst [vmem:[%s1447_s26 + $0x30] sm:$0xff] %v800_v53  ;;  %v812_v13 = vmul.f32 %v792_v50, %v774_v16  ;;  %v813_v15 = vmul.f32 %v792_v50, %v775_v34  ;;  %v814_v25 = vmul.f32 %v792_v50, %v776_v47 }
 0x15d   : > { %833 = vst [vmem:[%s1447_s26 + $0x38] sm:$0xff] %v801_v43  ;;  %834 = vst [vmem:[%s1447_s26 + $0x40] sm:$0xff] %v802_v61  ;;  %v815_v17 = vmul.f32 %v792_v50, %v777_v51  ;;  %v816_v57 = vmul.f32 %v792_v50, %v778_v48  ;;  %v817_v21 = vmul.f32 %v792_v50, %v779_v45 }
 0x15e   : > { %835 = vst [vmem:[%s1447_s26 + $0x48] sm:$0xff] %v803_v62  ;;  %836 = vst [vmem:[%s1447_s26 + $0x50] sm:$0xff] %v804_v35  ;;  %v818_v22 = vmul.f32 %v792_v50, %v780_v7  ;;  %v819_v23 = vmul.f32 %v792_v50, %v781_v8  ;;  %v820_v24 = vmul.f32 %v792_v50, %v782_v12 }
 0x15f   : > { %837 = vst [vmem:[%s1447_s26 + $0x58] sm:$0xff] %v805_v2  ;;  %838 = vst [vmem:[%s1447_s26 + $0x60] sm:$0xff] %v806_v41  ;;  %v821_v31 = vmul.f32 %v792_v50, %v783_v18  ;;  %v822_v33 = vmul.f32 %v792_v50, %v784_v27  ;;  %v823_v0 = vmul.f32 %v792_v50, %v785_v60 }
 0x160   : > { %839 = vst [vmem:[%s1447_s26 + $0x68] sm:$0xff] %v807_v4  ;;  %840 = vst [vmem:[%s1447_s26 + $0x70] sm:$0xff] %v808_v5  ;;  %v824_v55 = vmul.f32 %v792_v50, %v786_v37  ;;  %v825_v38 = vmul.f32 %v792_v50, %v787_v44 }
 0x161   : > { %841 = vst [vmem:[%s1447_s26 + $0x78] sm:$0xff] %v809_v28  ;;  %842 = vst [vmem:[%s1447_s26 + $0x80] sm:$0xff] %v810_v19 }
 0x162   : > { %843 = vst [vmem:[%s1447_s26 + $0x88] sm:$0xff] %v811_v11  ;;  %844 = vst [vmem:[%s1447_s26 + $0x90] sm:$0xff] %v812_v13 }
 0x163   : > { %845 = vst [vmem:[%s1447_s26 + $0x98] sm:$0xff] %v813_v15  ;;  %846 = vst [vmem:[%s1447_s26 + $0xa0] sm:$0xff] %v814_v25 }
 0x164   : > { %847 = vst [vmem:[%s1447_s26 + $0xa8] sm:$0xff] %v815_v17  ;;  %848 = vst [vmem:[%s1447_s26 + $0xb0] sm:$0xff] %v816_v57 }
 0x165   : > { %849 = vst [vmem:[%s1447_s26 + $0xb8] sm:$0xff] %v817_v21  ;;  %850 = vst [vmem:[%s1447_s26 + $0xc0] sm:$0xff] %v818_v22 }
 0x166   : > { %851 = vst [vmem:[%s1447_s26 + $0xc8] sm:$0xff] %v819_v23  ;;  %852 = vst [vmem:[%s1447_s26 + $0xd0] sm:$0xff] %v820_v24 }
 0x167   : > { %853 = vst [vmem:[%s1447_s26 + $0xd8] sm:$0xff] %v821_v31  ;;  %854 = vst [vmem:[%s1447_s26 + $0xe0] sm:$0xff] %v822_v33 }
 0x168   : > { %855 = vst [vmem:[%s1447_s26 + $0xe8] sm:$0xff] %v823_v0  ;;  %856 = vst [vmem:[%s1447_s26 + $0xf0] sm:$0xff] %v824_v55 }
 0x169   : > { %857 = vst [vmem:[%s1447_s26 + $0xf8] sm:$0xff] %v825_v38 }
 0x16a PF: > { %s12_s11 = sadd.s32 1, %s1109_s11   ;;  %s1501_s9 = smov %s1105_s10 }
 0x16b   : > { %p9_p5 = scmp.ge.s32.totalorder %s12_s11, 4   ;;  %s1502_s10 = smov %s1504_s12 }
 0x16d   :  { %11 = sbr.rel (!%p9_p5) target bundleno = 2 (0x2), region = 67 }

</bundles_post_ra>
